<compile_context>
chip_gen: v5e
topology: v5e:2x2
jax: 0.10.0
libtpu: 0.0.40
codegen_flags: <defaults>
</compile_context>

<pallas_src>
import functools
import math

import jax
import jax.numpy as jnp
import numpy as np
from jax import lax
from jax.experimental import pallas as pl
from jax.experimental.pallas import tpu as pltpu


NEG_INF = -1e18     # same sentinel as scores.masked_fill(mask, -1e+18)
LN_EPS = 1e-5       # torch.nn.LayerNorm default


def _layer_norm(x, g, b):
    """Row-wise LayerNorm over the last dim (biased variance, eps=1e-5)."""
    mu = jnp.mean(x, axis=-1, keepdims=True)
    xc = x - mu
    var = jnp.mean(xc * xc, axis=-1, keepdims=True)
    return xc * lax.rsqrt(var + LN_EPS) * g + b


# ----------------------------------------------------------------------------
# Fused transformer-block kernel (grid over batch)
# ----------------------------------------------------------------------------
def _mha_block_kernel(inp_ref, pos_ref, mask_ref,
                      ln1_g_ref, ln1_b_ref,
                      wqkv_ref, wfin_ref,
                      ln2_g_ref, ln2_b_ref,
                      w1_ref, b1_ref, w2_ref, b2_ref,
                      ln3_g_ref, ln3_b_ref,
                      out_ref, *, head_count):
    x = inp_ref[0]                                         # [T, D]
    T, D = x.shape
    dh = D // head_count
    scale = 1.0 / math.sqrt(dh)

    # dropout(inp) -> identity (eval); multi_head_layer_norm; + position_emb
    y = _layer_norm(x, ln1_g_ref[...], ln1_b_ref[...]) + pos_ref[...]    # [T, D]
    # y is residual_multi_head.

    # Fused QKV projection: one big MXU matmul instead of 3 small ones.
    qkv = jnp.dot(y, wqkv_ref[...], preferred_element_type=jnp.float32)  # [T, 3D]

    masked = mask_ref[0] >= 0.5                            # [T, T] True == masked

    # Per-head attention (static python loop: traced once, H is small).
    ctx_heads = []
    for h in range(head_count):
        q = qkv[:, h * dh:(h + 1) * dh] * scale            # query_up / sqrt(dh)
        k = qkv[:, D + h * dh: D + (h + 1) * dh]
        v = qkv[:, 2 * D + h * dh: 2 * D + (h + 1) * dh]
        s = jnp.einsum('qd,kd->qk', q, k,
                       preferred_element_type=jnp.float32)               # [T, T]
        s = jnp.where(masked, NEG_INF, s)
        m = jnp.max(s, axis=-1, keepdims=True)
        e = jnp.exp(s - m)
        p = e * pl.reciprocal(jnp.sum(e, axis=-1, keepdims=True), approx=False)
        ctx_heads.append(jnp.dot(p, v, preferred_element_type=jnp.float32))
    context = jnp.concatenate(ctx_heads, axis=-1)          # [T, D] (unshape)

    # final_linear + residual
    attn_out = jnp.dot(context, wfin_ref[...],
                       preferred_element_type=jnp.float32) + y

    # ffn_layer_norm -> residual_ffn
    ffn_in = _layer_norm(attn_out, ln2_g_ref[...], ln2_b_ref[...])

    # conv1 -> relu -> conv2 (dropouts are identity in eval)
    h1 = jnp.maximum(
        jnp.dot(ffn_in, w1_ref[...], preferred_element_type=jnp.float32)
        + b1_ref[...], 0.0)                                # [T, 4D]
    h2 = jnp.dot(h1, w2_ref[...],
                 preferred_element_type=jnp.float32) + b2_ref[...]       # [T, D]

    out = _layer_norm(ffn_in + h2, ln3_g_ref[...], ln3_b_ref[...])
    out_ref[0] = out.astype(out_ref.dtype)


def multi_headed_attention_forward(params, inp, attn_mask, *, head_count):
    """inp: [B, T, D]; attn_mask: [B, T, T] bool (True == masked) or None."""
    B, T, D = inp.shape
    pos = sinusoidal_pos_emb(T, D)                         # [T, D]
    if attn_mask is None:
        mask_f = jnp.zeros((B, T, T), jnp.float32)
    else:
        mask_f = attn_mask.astype(jnp.float32)

    # Pre-transpose weights once in the wrapper (no in-kernel transposes).
    wqkv_t = params["w_qkv"].T                             # [D, 3D]
    wfin_t = params["w_final"].T                           # [D, D]
    w1_t = params["w1"].T                                  # [D, 4D]
    w2_t = params["w2"].T                                  # [4D, D]
    row = lambda v: v.reshape(1, -1)

    kernel = functools.partial(_mha_block_kernel, head_count=head_count)
    const = lambda b: (0, 0)
    return pl.pallas_call(
        kernel,
        out_shape=jax.ShapeDtypeStruct((B, T, D), jnp.float32),
        grid_spec=pltpu.PrefetchScalarGridSpec(
            num_scalar_prefetch=0,
            grid=(B,),
            in_specs=[
                pl.BlockSpec((1, T, D), lambda b: (b, 0, 0)),    # inp
                pl.BlockSpec((T, D), const),                     # pos emb
                pl.BlockSpec((1, T, T), lambda b: (b, 0, 0)),    # attn mask
                pl.BlockSpec((1, D), const),                     # ln1 gamma
                pl.BlockSpec((1, D), const),                     # ln1 beta
                pl.BlockSpec((D, 3 * D), const),                 # Wqkv^T
                pl.BlockSpec((D, D), const),                     # Wfinal^T
                pl.BlockSpec((1, D), const),                     # ln2 gamma
                pl.BlockSpec((1, D), const),                     # ln2 beta
                pl.BlockSpec((D, 4 * D), const),                 # W1^T
                pl.BlockSpec((1, 4 * D), const),                 # b1
                pl.BlockSpec((4 * D, D), const),                 # W2^T
                pl.BlockSpec((1, D), const),                     # b2
                pl.BlockSpec((1, D), const),                     # ln3 gamma
                pl.BlockSpec((1, D), const),                     # ln3 beta
            ],
            out_specs=pl.BlockSpec((1, T, D), lambda b: (b, 0, 0)),
        ),
        compiler_params=pltpu.CompilerParams(
            dimension_semantics=("parallel",)),
    )(inp, pos, mask_f,
      row(params["ln1_g"]), row(params["ln1_b"]),
      wqkv_t, wfin_t,
      row(params["ln2_g"]), row(params["ln2_b"]),
      w1_t, row(params["b1"]), w2_t, row(params["b2"]),
      row(params["ln3_g"]), row(params["ln3_b"]))


# ----------------------------------------------------------------------------
# Positional embedding table
# ----------------------------------------------------------------------------
def sinusoidal_pos_emb(T, D):
    # TODO(synk): PosEncoding / make_positions are not defined in the provided
    # spec; a standard sinusoidal table over positions 0..T-1 is used (the same
    # table is used by both the kernel path and the reference).
    pos = np.arange(T, dtype=np.float32)[:, None]
    i = np.arange(D, dtype=np.float32)[None, :]
    angle = pos / np.power(10000.0, 2.0 * np.floor(i / 2.0) / D)
    pe = np.where((np.arange(D)[None, :] % 2) == 0, np.sin(angle), np.cos(angle))
    return jnp.asarray(pe, dtype=jnp.float32)


# ----------------------------------------------------------------------------
# Pure-JAX reference (mirrors the PyTorch forward exactly, eval mode)
# ----------------------------------------------------------------------------
def reference_forward(params, inp, attn_mask, *, head_count):
    B, T, D = inp.shape
    dh = D // head_count
    pos = sinusoidal_pos_emb(T, D)

    def ln(x, g, b):
        mu = jnp.mean(x, -1, keepdims=True)
        var = jnp.mean((x - mu) ** 2, -1, keepdims=True)
        return (x - mu) / jnp.sqrt(var + LN_EPS) * g + b

    x = ln(inp, params["ln1_g"], params["ln1_b"]) + pos[None]
    residual = x
    qkv = x @ params["w_qkv"].T
    q, k, v = jnp.split(qkv, 3, axis=-1)

    def heads(t):
        return t.reshape(B, T, head_count, dh).transpose(0, 2, 1, 3)

    qh = heads(q) / math.sqrt(dh)
    kh = heads(k)
    vh = heads(v)
    scores = jnp.einsum('bhqd,bhkd->bhqk', qh, kh)
    if attn_mask is not None:
        scores = jnp.where(attn_mask[:, None, :, :], NEG_INF, scores)
    p = jax.nn.softmax(scores, -1)
    ctx = jnp.einsum('bhqk,bhkd->bhqd', p, vh)
    ctx = ctx.transpose(0, 2, 1, 3).reshape(B, T, D)
    out = ctx @ params["w_final"].T + residual
    ffn_in = ln(out, params["ln2_g"], params["ln2_b"])
    h1 = jax.nn.relu(ffn_in @ params["w1"].T + params["b1"])
    h2 = h1 @ params["w2"].T + params["b2"]
    return ln(ffn_in + h2, params["ln3_g"], params["ln3_b"])


# ----------------------------------------------------------------------------
# Deterministic parameter init (mirrors module __init__ shapes / init schemes)
# ----------------------------------------------------------------------------
def init_params(key, D):
    ks = jax.random.split(key, 12)

    def xavier_normal(k, shape):
        fan_out, fan_in = shape
        std = math.sqrt(2.0 / (fan_in + fan_out))
        return std * jax.random.normal(k, shape, jnp.float32)

    def kaiming_normal(k, shape):
        fan_in = shape[1]
        std = math.sqrt(2.0 / fan_in)
        return std * jax.random.normal(k, shape, jnp.float32)

    small = lambda k, shape: 0.1 * jax.random.normal(k, shape, jnp.float32)

    return {
        "w_qkv": xavier_normal(ks[0], (3 * D, D)),     # inp_linear (no bias)
        "w_final": xavier_normal(ks[1], (D, D)),       # final_linear (no bias)
        "ln1_g": 1.0 + small(ks[2], (D,)),
        "ln1_b": small(ks[3], (D,)),
        "w1": kaiming_normal(ks[4], (4 * D, D)),       # conv1
        "b1": small(ks[5], (4 * D,)),
        "w2": xavier_normal(ks[6], (D, 4 * D)),        # conv2
        "b2": small(ks[7], (D,)),
        "ln2_g": 1.0 + small(ks[8], (D,)),
        "ln2_b": small(ks[9], (D,)),
        "ln3_g": 1.0 + small(ks[10], (D,)),
        "ln3_b": small(ks[11], (D,)),
    }


if __name__ == "__main__":
    args_model_dim = 32
    head_count = 4
    D = args_model_dim * 2          # model_dim = args.model_dim * 2 = 64
    B, T = 2, 8

    root = jax.random.PRNGKey(0)
    kp, kx = jax.random.split(root)
    params = init_params(kp, D)

    inp = jax.random.normal(kx, (B, T, D), jnp.float32)

    # key-padding attention mask (True == masked), broadcast over query rows
    valid = jnp.array([8, 5], jnp.int32)
    key_pad = jnp.arange(T)[None, :] >= valid[:, None]            # [B, T]
    attn_mask = jnp.broadcast_to(key_pad[:, None, :], (B, T, T))  # [B, T, T]

    fwd = jax.jit(functools.partial(multi_headed_attention_forward,
                                    head_count=head_count))
    out = jax.block_until_ready(fwd(params, inp, attn_mask))

    ref = jax.block_until_ready(
        reference_forward(params, inp, attn_mask, head_count=head_count))

    assert out.shape == (B, T, D), out.shape
    max_err = float(jnp.max(jnp.abs(out - ref)))
    assert max_err < 1e-3, f"mismatch vs reference: {max_err}"
    print("KERNEL_OK")
</pallas_src>

<mosaic_0001>
module attributes {stable_mosaic.version = 11 : i64} {
  func.func @_mha_block_kernel(%arg0: i32, %arg1: memref<1x8x64xf32, #tpu.memory_space<vmem>>, %arg2: memref<8x64xf32, #tpu.memory_space<vmem>>, %arg3: memref<1x8x8xf32, #tpu.memory_space<vmem>>, %arg4: memref<1x64xf32, #tpu.memory_space<vmem>>, %arg5: memref<1x64xf32, #tpu.memory_space<vmem>>, %arg6: memref<64x192xf32, #tpu.memory_space<vmem>>, %arg7: memref<64x64xf32, #tpu.memory_space<vmem>>, %arg8: memref<1x64xf32, #tpu.memory_space<vmem>>, %arg9: memref<1x64xf32, #tpu.memory_space<vmem>>, %arg10: memref<64x256xf32, #tpu.memory_space<vmem>>, %arg11: memref<1x256xf32, #tpu.memory_space<vmem>>, %arg12: memref<256x64xf32, #tpu.memory_space<vmem>>, %arg13: memref<1x64xf32, #tpu.memory_space<vmem>>, %arg14: memref<1x64xf32, #tpu.memory_space<vmem>>, %arg15: memref<1x64xf32, #tpu.memory_space<vmem>>, %arg16: memref<1x8x64xf32, #tpu.memory_space<vmem>>) attributes {dimension_semantics = [#tpu.dimension_semantics<parallel>], iteration_bounds = array<i64: 2>, scalar_prefetch = 0 : i64, scratch_operands = 0 : i64, tpu.core_type = #tpu.core_type<tc>, window_params = [{transform_indices = @transform_0, window_bounds = array<i64: 1, 8, 64>}, {pipeline_mode = #tpu.pipeline_mode<synchronous>, transform_indices = @transform_1, window_bounds = array<i64: 8, 64>}, {transform_indices = @transform_2, window_bounds = array<i64: 1, 8, 8>}, {pipeline_mode = #tpu.pipeline_mode<synchronous>, transform_indices = @transform_3, window_bounds = array<i64: 1, 64>}, {pipeline_mode = #tpu.pipeline_mode<synchronous>, transform_indices = @transform_4, window_bounds = array<i64: 1, 64>}, {pipeline_mode = #tpu.pipeline_mode<synchronous>, transform_indices = @transform_5, window_bounds = array<i64: 64, 192>}, {pipeline_mode = #tpu.pipeline_mode<synchronous>, transform_indices = @transform_6, window_bounds = array<i64: 64, 64>}, {pipeline_mode = #tpu.pipeline_mode<synchronous>, transform_indices = @transform_7, window_bounds = array<i64: 1, 64>}, {pipeline_mode = #tpu.pipeline_mode<synchronous>, transform_indices = @transform_8, window_bounds = array<i64: 1, 64>}, {pipeline_mode = #tpu.pipeline_mode<synchronous>, transform_indices = @transform_9, window_bounds = array<i64: 64, 256>}, {pipeline_mode = #tpu.pipeline_mode<synchronous>, transform_indices = @transform_10, window_bounds = array<i64: 1, 256>}, {pipeline_mode = #tpu.pipeline_mode<synchronous>, transform_indices = @transform_11, window_bounds = array<i64: 256, 64>}, {pipeline_mode = #tpu.pipeline_mode<synchronous>, transform_indices = @transform_12, window_bounds = array<i64: 1, 64>}, {pipeline_mode = #tpu.pipeline_mode<synchronous>, transform_indices = @transform_13, window_bounds = array<i64: 1, 64>}, {pipeline_mode = #tpu.pipeline_mode<synchronous>, transform_indices = @transform_14, window_bounds = array<i64: 1, 64>}, {transform_indices = @transform_15, window_bounds = array<i64: 1, 8, 64>}]} {
    %c0 = arith.constant 0 : index
    %c0_0 = arith.constant 0 : index
    %c0_1 = arith.constant 0 : index
    %0 = vector.load %arg1[%c0, %c0_0, %c0_1] : memref<1x8x64xf32, #tpu.memory_space<vmem>>, vector<1x8x64xf32>
    %1 = vector.shape_cast %0 : vector<1x8x64xf32> to vector<8x64xf32>
    %c0_2 = arith.constant 0 : index
    %c0_3 = arith.constant 0 : index
    %2 = vector.load %arg4[%c0_2, %c0_3] : memref<1x64xf32, #tpu.memory_space<vmem>>, vector<1x64xf32>
    %c0_4 = arith.constant 0 : index
    %c0_5 = arith.constant 0 : index
    %3 = vector.load %arg5[%c0_4, %c0_5] : memref<1x64xf32, #tpu.memory_space<vmem>>, vector<1x64xf32>
    %cst = arith.constant dense<0.000000e+00> : vector<8xf32>
    %4 = vector.multi_reduction <add>, %1, %cst [1] : vector<8x64xf32> to vector<8xf32>
    %5 = vector.shape_cast %4 : vector<8xf32> to vector<8x1xf32>
    %cst_6 = arith.constant 6.400000e+01 : f32
    %6 = vector.broadcast %cst_6 : f32 to vector<8x1xf32>
    %7 = arith.divf %5, %6 : vector<8x1xf32>
    %8 = vector.broadcast %7 : vector<8x1xf32> to vector<8x64xf32>
    %9 = arith.subf %1, %8 : vector<8x64xf32>
    %10 = arith.mulf %9, %9 : vector<8x64xf32>
    %cst_7 = arith.constant dense<0.000000e+00> : vector<8xf32>
    %11 = vector.multi_reduction <add>, %10, %cst_7 [1] : vector<8x64xf32> to vector<8xf32>
    %12 = vector.shape_cast %11 : vector<8xf32> to vector<8x1xf32>
    %cst_8 = arith.constant 6.400000e+01 : f32
    %13 = vector.broadcast %cst_8 : f32 to vector<8x1xf32>
    %14 = arith.divf %12, %13 : vector<8x1xf32>
    %cst_9 = arith.constant 9.99999974E-6 : f32
    %15 = vector.broadcast %cst_9 : f32 to vector<8x1xf32>
    %16 = arith.addf %14, %15 : vector<8x1xf32>
    %17 = math.rsqrt %16 : vector<8x1xf32>
    %18 = vector.broadcast %17 : vector<8x1xf32> to vector<8x64xf32>
    %19 = arith.mulf %9, %18 : vector<8x64xf32>
    %20 = vector.broadcast %2 : vector<1x64xf32> to vector<8x64xf32>
    %21 = arith.mulf %19, %20 : vector<8x64xf32>
    %22 = vector.broadcast %3 : vector<1x64xf32> to vector<8x64xf32>
    %23 = arith.addf %21, %22 : vector<8x64xf32>
    %c0_10 = arith.constant 0 : index
    %c0_11 = arith.constant 0 : index
    %24 = vector.load %arg2[%c0_10, %c0_11] : memref<8x64xf32, #tpu.memory_space<vmem>>, vector<8x64xf32>
    %25 = arith.addf %23, %24 : vector<8x64xf32>
    %c0_12 = arith.constant 0 : index
    %c0_13 = arith.constant 0 : index
    %26 = vector.load %arg6[%c0_12, %c0_13] : memref<64x192xf32, #tpu.memory_space<vmem>>, vector<64x192xf32>
    %cst_14 = arith.constant dense<0.000000e+00> : vector<8x192xf32>
    %27 = tpu.matmul %25, %26, %cst_14 {dimension_numbers = #tpu.dot_dimension_numbers<[1], [0], [0], [1], [0, 0, 1, 1], [], []>} : vector<8x64xf32>, vector<64x192xf32>, vector<8x192xf32> -> vector<8x192xf32>
    %c0_15 = arith.constant 0 : index
    %c0_16 = arith.constant 0 : index
    %c0_17 = arith.constant 0 : index
    %28 = vector.load %arg3[%c0_15, %c0_16, %c0_17] : memref<1x8x8xf32, #tpu.memory_space<vmem>>, vector<1x8x8xf32>
    %29 = vector.shape_cast %28 : vector<1x8x8xf32> to vector<8x8xf32>
    %cst_18 = arith.constant 5.000000e-01 : f32
    %30 = vector.broadcast %cst_18 : f32 to vector<8x8xf32>
    %31 = arith.cmpf oge, %29, %30 : vector<8x8xf32>
    %32 = vector.extract_strided_slice %27 {offsets = [0, 0], sizes = [8, 16], strides = [1, 1]} : vector<8x192xf32> to vector<8x16xf32>
    %cst_19 = arith.constant 2.500000e-01 : f32
    %33 = vector.broadcast %cst_19 : f32 to vector<8x16xf32>
    %34 = arith.mulf %32, %33 : vector<8x16xf32>
    %35 = vector.extract_strided_slice %27 {offsets = [0, 64], sizes = [8, 16], strides = [1, 1]} : vector<8x192xf32> to vector<8x16xf32>
    %36 = vector.extract_strided_slice %27 {offsets = [0, 128], sizes = [8, 16], strides = [1, 1]} : vector<8x192xf32> to vector<8x16xf32>
    "tpu.trace_start"() <{level = 10 : i32, message = "qd,kd->qk"}> : () -> ()
    %cst_20 = arith.constant dense<0.000000e+00> : vector<8x8xf32>
    %37 = tpu.matmul %34, %35, %cst_20 {dimension_numbers = #tpu.dot_dimension_numbers<[1], [1], [0], [0], [0, 0, 1, 0], [], []>} : vector<8x16xf32>, vector<8x16xf32>, vector<8x8xf32> -> vector<8x8xf32>
    %cst_21 = arith.constant -9.99999984E+17 : f32
    "tpu.trace_stop"() : () -> ()
    %38 = vector.broadcast %cst_21 : f32 to vector<8x8xf32>
    %39 = arith.select %31, %38, %37 : vector<8x8xi1>, vector<8x8xf32>
    %cst_22 = arith.constant dense<0xFF800000> : vector<8xf32>
    %40 = vector.multi_reduction <maximumf>, %39, %cst_22 [1] : vector<8x8xf32> to vector<8xf32>
    %41 = vector.shape_cast %40 : vector<8xf32> to vector<8x1xf32>
    %42 = vector.broadcast %41 : vector<8x1xf32> to vector<8x8xf32>
    %43 = arith.subf %39, %42 : vector<8x8xf32>
    %44 = math.exp %43 : vector<8x8xf32>
    %cst_23 = arith.constant dense<0.000000e+00> : vector<8xf32>
    %45 = vector.multi_reduction <add>, %44, %cst_23 [1] : vector<8x8xf32> to vector<8xf32>
    %46 = vector.shape_cast %45 : vector<8xf32> to vector<8x1xf32>
    %47 = tpu.reciprocal %46 : vector<8x1xf32> -> vector<8x1xf32>
    %48 = vector.broadcast %47 : vector<8x1xf32> to vector<8x8xf32>
    %49 = arith.mulf %44, %48 : vector<8x8xf32>
    %cst_24 = arith.constant dense<0.000000e+00> : vector<8x16xf32>
    %50 = tpu.matmul %49, %36, %cst_24 {dimension_numbers = #tpu.dot_dimension_numbers<[1], [0], [0], [1], [0, 0, 1, 1], [], []>} : vector<8x8xf32>, vector<8x16xf32>, vector<8x16xf32> -> vector<8x16xf32>
    %51 = vector.extract_strided_slice %27 {offsets = [0, 16], sizes = [8, 16], strides = [1, 1]} : vector<8x192xf32> to vector<8x16xf32>
    %cst_25 = arith.constant 2.500000e-01 : f32
    %52 = vector.broadcast %cst_25 : f32 to vector<8x16xf32>
    %53 = arith.mulf %51, %52 : vector<8x16xf32>
    %54 = vector.extract_strided_slice %27 {offsets = [0, 80], sizes = [8, 16], strides = [1, 1]} : vector<8x192xf32> to vector<8x16xf32>
    %55 = vector.extract_strided_slice %27 {offsets = [0, 144], sizes = [8, 16], strides = [1, 1]} : vector<8x192xf32> to vector<8x16xf32>
    "tpu.trace_start"() <{level = 10 : i32, message = "qd,kd->qk"}> : () -> ()
    %cst_26 = arith.constant dense<0.000000e+00> : vector<8x8xf32>
    %56 = tpu.matmul %53, %54, %cst_26 {dimension_numbers = #tpu.dot_dimension_numbers<[1], [1], [0], [0], [0, 0, 1, 0], [], []>} : vector<8x16xf32>, vector<8x16xf32>, vector<8x8xf32> -> vector<8x8xf32>
    %cst_27 = arith.constant -9.99999984E+17 : f32
    "tpu.trace_stop"() : () -> ()
    %57 = vector.broadcast %cst_27 : f32 to vector<8x8xf32>
    %58 = arith.select %31, %57, %56 : vector<8x8xi1>, vector<8x8xf32>
    %cst_28 = arith.constant dense<0xFF800000> : vector<8xf32>
    %59 = vector.multi_reduction <maximumf>, %58, %cst_28 [1] : vector<8x8xf32> to vector<8xf32>
    %60 = vector.shape_cast %59 : vector<8xf32> to vector<8x1xf32>
    %61 = vector.broadcast %60 : vector<8x1xf32> to vector<8x8xf32>
    %62 = arith.subf %58, %61 : vector<8x8xf32>
    %63 = math.exp %62 : vector<8x8xf32>
    %cst_29 = arith.constant dense<0.000000e+00> : vector<8xf32>
    %64 = vector.multi_reduction <add>, %63, %cst_29 [1] : vector<8x8xf32> to vector<8xf32>
    %65 = vector.shape_cast %64 : vector<8xf32> to vector<8x1xf32>
    %66 = tpu.reciprocal %65 : vector<8x1xf32> -> vector<8x1xf32>
    %67 = vector.broadcast %66 : vector<8x1xf32> to vector<8x8xf32>
    %68 = arith.mulf %63, %67 : vector<8x8xf32>
    %cst_30 = arith.constant dense<0.000000e+00> : vector<8x16xf32>
    %69 = tpu.matmul %68, %55, %cst_30 {dimension_numbers = #tpu.dot_dimension_numbers<[1], [0], [0], [1], [0, 0, 1, 1], [], []>} : vector<8x8xf32>, vector<8x16xf32>, vector<8x16xf32> -> vector<8x16xf32>
    %70 = vector.extract_strided_slice %27 {offsets = [0, 32], sizes = [8, 16], strides = [1, 1]} : vector<8x192xf32> to vector<8x16xf32>
    %cst_31 = arith.constant 2.500000e-01 : f32
    %71 = vector.broadcast %cst_31 : f32 to vector<8x16xf32>
    %72 = arith.mulf %70, %71 : vector<8x16xf32>
    %73 = vector.extract_strided_slice %27 {offsets = [0, 96], sizes = [8, 16], strides = [1, 1]} : vector<8x192xf32> to vector<8x16xf32>
    %74 = vector.extract_strided_slice %27 {offsets = [0, 160], sizes = [8, 16], strides = [1, 1]} : vector<8x192xf32> to vector<8x16xf32>
    "tpu.trace_start"() <{level = 10 : i32, message = "qd,kd->qk"}> : () -> ()
    %cst_32 = arith.constant dense<0.000000e+00> : vector<8x8xf32>
    %75 = tpu.matmul %72, %73, %cst_32 {dimension_numbers = #tpu.dot_dimension_numbers<[1], [1], [0], [0], [0, 0, 1, 0], [], []>} : vector<8x16xf32>, vector<8x16xf32>, vector<8x8xf32> -> vector<8x8xf32>
    %cst_33 = arith.constant -9.99999984E+17 : f32
    "tpu.trace_stop"() : () -> ()
    %76 = vector.broadcast %cst_33 : f32 to vector<8x8xf32>
    %77 = arith.select %31, %76, %75 : vector<8x8xi1>, vector<8x8xf32>
    %cst_34 = arith.constant dense<0xFF800000> : vector<8xf32>
    %78 = vector.multi_reduction <maximumf>, %77, %cst_34 [1] : vector<8x8xf32> to vector<8xf32>
    %79 = vector.shape_cast %78 : vector<8xf32> to vector<8x1xf32>
    %80 = vector.broadcast %79 : vector<8x1xf32> to vector<8x8xf32>
    %81 = arith.subf %77, %80 : vector<8x8xf32>
    %82 = math.exp %81 : vector<8x8xf32>
    %cst_35 = arith.constant dense<0.000000e+00> : vector<8xf32>
    %83 = vector.multi_reduction <add>, %82, %cst_35 [1] : vector<8x8xf32> to vector<8xf32>
    %84 = vector.shape_cast %83 : vector<8xf32> to vector<8x1xf32>
    %85 = tpu.reciprocal %84 : vector<8x1xf32> -> vector<8x1xf32>
    %86 = vector.broadcast %85 : vector<8x1xf32> to vector<8x8xf32>
    %87 = arith.mulf %82, %86 : vector<8x8xf32>
    %cst_36 = arith.constant dense<0.000000e+00> : vector<8x16xf32>
    %88 = tpu.matmul %87, %74, %cst_36 {dimension_numbers = #tpu.dot_dimension_numbers<[1], [0], [0], [1], [0, 0, 1, 1], [], []>} : vector<8x8xf32>, vector<8x16xf32>, vector<8x16xf32> -> vector<8x16xf32>
    %89 = vector.extract_strided_slice %27 {offsets = [0, 48], sizes = [8, 16], strides = [1, 1]} : vector<8x192xf32> to vector<8x16xf32>
    %cst_37 = arith.constant 2.500000e-01 : f32
    %90 = vector.broadcast %cst_37 : f32 to vector<8x16xf32>
    %91 = arith.mulf %89, %90 : vector<8x16xf32>
    %92 = vector.extract_strided_slice %27 {offsets = [0, 112], sizes = [8, 16], strides = [1, 1]} : vector<8x192xf32> to vector<8x16xf32>
    %93 = vector.extract_strided_slice %27 {offsets = [0, 176], sizes = [8, 16], strides = [1, 1]} : vector<8x192xf32> to vector<8x16xf32>
    "tpu.trace_start"() <{level = 10 : i32, message = "qd,kd->qk"}> : () -> ()
    %cst_38 = arith.constant dense<0.000000e+00> : vector<8x8xf32>
    %94 = tpu.matmul %91, %92, %cst_38 {dimension_numbers = #tpu.dot_dimension_numbers<[1], [1], [0], [0], [0, 0, 1, 0], [], []>} : vector<8x16xf32>, vector<8x16xf32>, vector<8x8xf32> -> vector<8x8xf32>
    %cst_39 = arith.constant -9.99999984E+17 : f32
    "tpu.trace_stop"() : () -> ()
    %95 = vector.broadcast %cst_39 : f32 to vector<8x8xf32>
    %96 = arith.select %31, %95, %94 : vector<8x8xi1>, vector<8x8xf32>
    %cst_40 = arith.constant dense<0xFF800000> : vector<8xf32>
    %97 = vector.multi_reduction <maximumf>, %96, %cst_40 [1] : vector<8x8xf32> to vector<8xf32>
    %98 = vector.shape_cast %97 : vector<8xf32> to vector<8x1xf32>
    %99 = vector.broadcast %98 : vector<8x1xf32> to vector<8x8xf32>
    %100 = arith.subf %96, %99 : vector<8x8xf32>
    %101 = math.exp %100 : vector<8x8xf32>
    %cst_41 = arith.constant dense<0.000000e+00> : vector<8xf32>
    %102 = vector.multi_reduction <add>, %101, %cst_41 [1] : vector<8x8xf32> to vector<8xf32>
    %103 = vector.shape_cast %102 : vector<8xf32> to vector<8x1xf32>
    %104 = tpu.reciprocal %103 : vector<8x1xf32> -> vector<8x1xf32>
    %105 = vector.broadcast %104 : vector<8x1xf32> to vector<8x8xf32>
    %106 = arith.mulf %101, %105 : vector<8x8xf32>
    %cst_42 = arith.constant dense<0.000000e+00> : vector<8x16xf32>
    %107 = tpu.matmul %106, %93, %cst_42 {dimension_numbers = #tpu.dot_dimension_numbers<[1], [0], [0], [1], [0, 0, 1, 1], [], []>} : vector<8x8xf32>, vector<8x16xf32>, vector<8x16xf32> -> vector<8x16xf32>
    %108 = tpu.concatenate %50, %69, %88, %107 in 1 : vector<8x16xf32>, vector<8x16xf32>, vector<8x16xf32>, vector<8x16xf32> -> vector<8x64xf32>
    %c0_43 = arith.constant 0 : index
    %c0_44 = arith.constant 0 : index
    %109 = vector.load %arg7[%c0_43, %c0_44] : memref<64x64xf32, #tpu.memory_space<vmem>>, vector<64x64xf32>
    %cst_45 = arith.constant dense<0.000000e+00> : vector<8x64xf32>
    %110 = tpu.matmul %108, %109, %cst_45 {dimension_numbers = #tpu.dot_dimension_numbers<[1], [0], [0], [1], [0, 0, 1, 1], [], []>} : vector<8x64xf32>, vector<64x64xf32>, vector<8x64xf32> -> vector<8x64xf32>
    %111 = arith.addf %110, %25 : vector<8x64xf32>
    %c0_46 = arith.constant 0 : index
    %c0_47 = arith.constant 0 : index
    %112 = vector.load %arg8[%c0_46, %c0_47] : memref<1x64xf32, #tpu.memory_space<vmem>>, vector<1x64xf32>
    %c0_48 = arith.constant 0 : index
    %c0_49 = arith.constant 0 : index
    %113 = vector.load %arg9[%c0_48, %c0_49] : memref<1x64xf32, #tpu.memory_space<vmem>>, vector<1x64xf32>
    %cst_50 = arith.constant dense<0.000000e+00> : vector<8xf32>
    %114 = vector.multi_reduction <add>, %111, %cst_50 [1] : vector<8x64xf32> to vector<8xf32>
    %115 = vector.shape_cast %114 : vector<8xf32> to vector<8x1xf32>
    %cst_51 = arith.constant 6.400000e+01 : f32
    %116 = vector.broadcast %cst_51 : f32 to vector<8x1xf32>
    %117 = arith.divf %115, %116 : vector<8x1xf32>
    %118 = vector.broadcast %117 : vector<8x1xf32> to vector<8x64xf32>
    %119 = arith.subf %111, %118 : vector<8x64xf32>
    %120 = arith.mulf %119, %119 : vector<8x64xf32>
    %cst_52 = arith.constant dense<0.000000e+00> : vector<8xf32>
    %121 = vector.multi_reduction <add>, %120, %cst_52 [1] : vector<8x64xf32> to vector<8xf32>
    %122 = vector.shape_cast %121 : vector<8xf32> to vector<8x1xf32>
    %cst_53 = arith.constant 6.400000e+01 : f32
    %123 = vector.broadcast %cst_53 : f32 to vector<8x1xf32>
    %124 = arith.divf %122, %123 : vector<8x1xf32>
    %cst_54 = arith.constant 9.99999974E-6 : f32
    %125 = vector.broadcast %cst_54 : f32 to vector<8x1xf32>
    %126 = arith.addf %124, %125 : vector<8x1xf32>
    %127 = math.rsqrt %126 : vector<8x1xf32>
    %128 = vector.broadcast %127 : vector<8x1xf32> to vector<8x64xf32>
    %129 = arith.mulf %119, %128 : vector<8x64xf32>
    %130 = vector.broadcast %112 : vector<1x64xf32> to vector<8x64xf32>
    %131 = arith.mulf %129, %130 : vector<8x64xf32>
    %132 = vector.broadcast %113 : vector<1x64xf32> to vector<8x64xf32>
    %133 = arith.addf %131, %132 : vector<8x64xf32>
    %c0_55 = arith.constant 0 : index
    %c0_56 = arith.constant 0 : index
    %134 = vector.load %arg10[%c0_55, %c0_56] : memref<64x256xf32, #tpu.memory_space<vmem>>, vector<64x256xf32>
    %cst_57 = arith.constant dense<0.000000e+00> : vector<8x256xf32>
    %135 = tpu.matmul %133, %134, %cst_57 {dimension_numbers = #tpu.dot_dimension_numbers<[1], [0], [0], [1], [0, 0, 1, 1], [], []>} : vector<8x64xf32>, vector<64x256xf32>, vector<8x256xf32> -> vector<8x256xf32>
    %c0_58 = arith.constant 0 : index
    %c0_59 = arith.constant 0 : index
    %136 = vector.load %arg11[%c0_58, %c0_59] : memref<1x256xf32, #tpu.memory_space<vmem>>, vector<1x256xf32>
    %137 = vector.broadcast %136 : vector<1x256xf32> to vector<8x256xf32>
    %138 = arith.addf %135, %137 : vector<8x256xf32>
    %cst_60 = arith.constant 0.000000e+00 : f32
    %139 = vector.broadcast %cst_60 : f32 to vector<8x256xf32>
    %140 = arith.maximumf %138, %139 : vector<8x256xf32>
    %c0_61 = arith.constant 0 : index
    %c0_62 = arith.constant 0 : index
    %141 = vector.load %arg12[%c0_61, %c0_62] : memref<256x64xf32, #tpu.memory_space<vmem>>, vector<256x64xf32>
    %cst_63 = arith.constant dense<0.000000e+00> : vector<8x64xf32>
    %142 = tpu.matmul %140, %141, %cst_63 {dimension_numbers = #tpu.dot_dimension_numbers<[1], [0], [0], [1], [0, 0, 1, 1], [], []>} : vector<8x256xf32>, vector<256x64xf32>, vector<8x64xf32> -> vector<8x64xf32>
    %c0_64 = arith.constant 0 : index
    %c0_65 = arith.constant 0 : index
    %143 = vector.load %arg13[%c0_64, %c0_65] : memref<1x64xf32, #tpu.memory_space<vmem>>, vector<1x64xf32>
    %144 = vector.broadcast %143 : vector<1x64xf32> to vector<8x64xf32>
    %145 = arith.addf %142, %144 : vector<8x64xf32>
    %146 = arith.addf %133, %145 : vector<8x64xf32>
    %c0_66 = arith.constant 0 : index
    %c0_67 = arith.constant 0 : index
    %147 = vector.load %arg14[%c0_66, %c0_67] : memref<1x64xf32, #tpu.memory_space<vmem>>, vector<1x64xf32>
    %c0_68 = arith.constant 0 : index
    %c0_69 = arith.constant 0 : index
    %148 = vector.load %arg15[%c0_68, %c0_69] : memref<1x64xf32, #tpu.memory_space<vmem>>, vector<1x64xf32>
    %cst_70 = arith.constant dense<0.000000e+00> : vector<8xf32>
    %149 = vector.multi_reduction <add>, %146, %cst_70 [1] : vector<8x64xf32> to vector<8xf32>
    %150 = vector.shape_cast %149 : vector<8xf32> to vector<8x1xf32>
    %cst_71 = arith.constant 6.400000e+01 : f32
    %151 = vector.broadcast %cst_71 : f32 to vector<8x1xf32>
    %152 = arith.divf %150, %151 : vector<8x1xf32>
    %153 = vector.broadcast %152 : vector<8x1xf32> to vector<8x64xf32>
    %154 = arith.subf %146, %153 : vector<8x64xf32>
    %155 = arith.mulf %154, %154 : vector<8x64xf32>
    %cst_72 = arith.constant dense<0.000000e+00> : vector<8xf32>
    %156 = vector.multi_reduction <add>, %155, %cst_72 [1] : vector<8x64xf32> to vector<8xf32>
    %157 = vector.shape_cast %156 : vector<8xf32> to vector<8x1xf32>
    %cst_73 = arith.constant 6.400000e+01 : f32
    %158 = vector.broadcast %cst_73 : f32 to vector<8x1xf32>
    %159 = arith.divf %157, %158 : vector<8x1xf32>
    %cst_74 = arith.constant 9.99999974E-6 : f32
    %160 = vector.broadcast %cst_74 : f32 to vector<8x1xf32>
    %161 = arith.addf %159, %160 : vector<8x1xf32>
    %162 = math.rsqrt %161 : vector<8x1xf32>
    %163 = vector.broadcast %162 : vector<8x1xf32> to vector<8x64xf32>
    %164 = arith.mulf %154, %163 : vector<8x64xf32>
    %165 = vector.broadcast %147 : vector<1x64xf32> to vector<8x64xf32>
    %166 = arith.mulf %164, %165 : vector<8x64xf32>
    %167 = vector.broadcast %148 : vector<1x64xf32> to vector<8x64xf32>
    %168 = arith.addf %166, %167 : vector<8x64xf32>
    %c0_75 = arith.constant 0 : index
    %c0_76 = arith.constant 0 : index
    %c0_77 = arith.constant 0 : index
    %169 = vector.load %arg16[%c0_75, %c0_76, %c0_77] : memref<1x8x64xf32, #tpu.memory_space<vmem>>, vector<1x8x64xf32>
    %170 = vector.shape_cast %169 : vector<1x8x64xf32> to vector<8x64xf32>
    %171 = vector.shape_cast %168 : vector<8x64xf32> to vector<1x8x64xf32>
    tpu.vector_store %arg16[%c0_75, %c0_76, %c0_77], %171 {strides = array<i32>} : memref<1x8x64xf32, #tpu.memory_space<vmem>>, vector<1x8x64xf32>,
    return
  }
  func.func @transform_0(%arg0: i32) -> (i32, i32, i32) {
    %c0_i32 = arith.constant 0 : i32
    %c0_i32_0 = arith.constant 0 : i32
    %c0_i32_1 = arith.constant 0 : i32
    return %arg0, %c0_i32, %c0_i32_0 : i32, i32, i32
  }
  func.func @transform_1(%arg0: i32) -> (i32, i32) {
    %c0_i32 = arith.constant 0 : i32
    %c0_i32_0 = arith.constant 0 : i32
    %c0_i32_1 = arith.constant 0 : i32
    return %c0_i32, %c0_i32_0 : i32, i32
  }
  func.func @transform_2(%arg0: i32) -> (i32, i32, i32) {
    %c0_i32 = arith.constant 0 : i32
    %c0_i32_0 = arith.constant 0 : i32
    %c0_i32_1 = arith.constant 0 : i32
    return %arg0, %c0_i32, %c0_i32_0 : i32, i32, i32
  }
  func.func @transform_3(%arg0: i32) -> (i32, i32) {
    %c0_i32 = arith.constant 0 : i32
    %c0_i32_0 = arith.constant 0 : i32
    %c0_i32_1 = arith.constant 0 : i32
    return %c0_i32, %c0_i32_0 : i32, i32
  }
  func.func @transform_4(%arg0: i32) -> (i32, i32) {
    %c0_i32 = arith.constant 0 : i32
    %c0_i32_0 = arith.constant 0 : i32
    %c0_i32_1 = arith.constant 0 : i32
    return %c0_i32, %c0_i32_0 : i32, i32
  }
  func.func @transform_5(%arg0: i32) -> (i32, i32) {
    %c0_i32 = arith.constant 0 : i32
    %c0_i32_0 = arith.constant 0 : i32
    %c0_i32_1 = arith.constant 0 : i32
    return %c0_i32, %c0_i32_0 : i32, i32
  }
  func.func @transform_6(%arg0: i32) -> (i32, i32) {
    %c0_i32 = arith.constant 0 : i32
    %c0_i32_0 = arith.constant 0 : i32
    %c0_i32_1 = arith.constant 0 : i32
    return %c0_i32, %c0_i32_0 : i32, i32
  }
  func.func @transform_7(%arg0: i32) -> (i32, i32) {
    %c0_i32 = arith.constant 0 : i32
    %c0_i32_0 = arith.constant 0 : i32
    %c0_i32_1 = arith.constant 0 : i32
    return %c0_i32, %c0_i32_0 : i32, i32
  }
  func.func @transform_8(%arg0: i32) -> (i32, i32) {
    %c0_i32 = arith.constant 0 : i32
    %c0_i32_0 = arith.constant 0 : i32
    %c0_i32_1 = arith.constant 0 : i32
    return %c0_i32, %c0_i32_0 : i32, i32
  }
  func.func @transform_9(%arg0: i32) -> (i32, i32) {
    %c0_i32 = arith.constant 0 : i32
    %c0_i32_0 = arith.constant 0 : i32
    %c0_i32_1 = arith.constant 0 : i32
    return %c0_i32, %c0_i32_0 : i32, i32
  }
  func.func @transform_10(%arg0: i32) -> (i32, i32) {
    %c0_i32 = arith.constant 0 : i32
    %c0_i32_0 = arith.constant 0 : i32
    %c0_i32_1 = arith.constant 0 : i32
    return %c0_i32, %c0_i32_0 : i32, i32
  }
  func.func @transform_11(%arg0: i32) -> (i32, i32) {
    %c0_i32 = arith.constant 0 : i32
    %c0_i32_0 = arith.constant 0 : i32
    %c0_i32_1 = arith.constant 0 : i32
    return %c0_i32, %c0_i32_0 : i32, i32
  }
  func.func @transform_12(%arg0: i32) -> (i32, i32) {
    %c0_i32 = arith.constant 0 : i32
    %c0_i32_0 = arith.constant 0 : i32
    %c0_i32_1 = arith.constant 0 : i32
    return %c0_i32, %c0_i32_0 : i32, i32
  }
  func.func @transform_13(%arg0: i32) -> (i32, i32) {
    %c0_i32 = arith.constant 0 : i32
    %c0_i32_0 = arith.constant 0 : i32
    %c0_i32_1 = arith.constant 0 : i32
    return %c0_i32, %c0_i32_0 : i32, i32
  }
  func.func @transform_14(%arg0: i32) -> (i32, i32) {
    %c0_i32 = arith.constant 0 : i32
    %c0_i32_0 = arith.constant 0 : i32
    %c0_i32_1 = arith.constant 0 : i32
    return %c0_i32, %c0_i32_0 : i32, i32
  }
  func.func @transform_15(%arg0: i32) -> (i32, i32, i32) {
    %c0_i32 = arith.constant 0 : i32
    %c0_i32_0 = arith.constant 0 : i32
    %c0_i32_1 = arith.constant 0 : i32
    return %arg0, %c0_i32, %c0_i32_0 : i32, i32, i32
  }
}

</mosaic_0001>

<bundles_post_ra>
// kernel: multi_headed_attention_forward.1
= control target key start
LH: loop header
LB: loop body
LE: loop exit
PB: predicated region body
PF: predicated region fallthrough
CT: control target
= control target key end

     0   :  { %s1944_s0 = inlined_call_operand.vmem [shape: f32[2,8,64], index: 0, kind: input, shape index: {}]   ;;  %s1945_s1 = inlined_call_operand.vmem [shape: f32[8,64], index: 1, kind: input, shape index: {}]   ;;  %s1946_s2 = inlined_call_operand.vmem [shape: f32[2,8,8], index: 2, kind: input, shape index: {}]   ;;  %s1947_s3 = inlined_call_operand.vmem [shape: f32[1,64], index: 3, kind: input, shape index: {}]   ;;  %s1948_s4 = inlined_call_operand.vmem [shape: f32[1,64], index: 4, kind: input, shape index: {}]   ;;  %s1949_s5 = inlined_call_operand.vmem [shape: f32[64,192], index: 5, kind: input, shape index: {}]   ;;  %s1950_s6 = inlined_call_operand.vmem [shape: f32[64,64], index: 6, kind: input, shape index: {}]   ;;  %s1951_s7 = inlined_call_operand.vmem [shape: f32[1,64], index: 7, kind: input, shape index: {}]   ;;  %s1952_s8 = inlined_call_operand.vmem [shape: f32[1,64], index: 8, kind: input, shape index: {}]   ;;  %s1953_s9 = inlined_call_operand.vmem [shape: f32[64,256], index: 9, kind: input, shape index: {}]   ;;  %s1954_s10 = inlined_call_operand.vmem [shape: f32[1,256], index: 10, kind: input, shape index: {}]   ;;  %s1955_s11 = inlined_call_operand.vmem [shape: f32[256,64], index: 11, kind: input, shape index: {}]   ;;  %s1956_s12 = inlined_call_operand.vmem [shape: f32[1,64], index: 12, kind: input, shape index: {}]   ;;  %s1957_s13 = inlined_call_operand.vmem [shape: f32[1,64], index: 13, kind: input, shape index: {}]   ;;  %s1958_s14 = inlined_call_operand.vmem [shape: f32[1,64], index: 14, kind: input, shape index: {}]   ;;  %s1959_s15 = inlined_call_operand.hbm [shape: f32[2,8,64], index: 15, kind: output, shape index: {}]  }
   0x1   :  { %1965 = sst [smem:[#allocation9_spill]] %s1944_s0 }
   0x2   :  { %1966 = sst [smem:[#allocation10_spill]] %s1945_s1 }
   0x3   :  { %20 = vsyncpa [#allocation3], 0 }
   0x4   :  { %22 = vsyncpa [#allocation3 + $0x1], 0  ;;  %s1530_s18 = smov 0   ;;  %s1532_s19 = smov 0  }
   0x5   :  { %s1534_s20 = smov 0   ;;  %s1536_s21 = smov 0  }
   0x6 LB: > { %1967 = sst [smem:[#allocation5_spill]] %s1436_s20  ;;  %s1551_s22 = sadd.s32 4294967295, %s1440_s21   ;;  %s1440_s21 = sphi %s1536_s21, %s1977_s21   ;;  %s1436_s20 = sphi %s1534_s20, %s1979_s20   ;;  %s1432_s19 = sphi %s1532_s19, %s1981_s19   ;;  %s1428_s18 = sphi %s1530_s18, %s1980_s18  }
   0x7   : > { %s1272_s23 = sadd.s32 4294967294, %s1440_s21   ;;  %s1555_s24 = sadd.s32 1, %s1440_s21  }
   0x8   : > { %1968 = sst [smem:[#allocation6_spill]] %s1555_s24  ;;  %s360_s25 = sadd.s32 1, %s1436_s20 }
   0x9   : > { %s357_s26 = ssub.s32 %s1440_s21, %s1555_s24  ;;  %p370_p0 = scmp.ne.s32.totalorder %s1436_s20, %s1432_s19 }
   0xa   : > { %p358_p1 = scmp.eq.s32.totalorder %s357_s26, 0  ;;  %p371_p2 = scmp.eq.s32.totalorder %s1551_s22, 1 }
   0xb   : > { %p376_p3 = scmp.ne.s32.totalorder %s1432_s19, %s1428_s18  ;;  %p377_p4 = scmp.eq.s32.totalorder %s1272_s23, 1 }
   0xc   : > { %s1566_s27 = scalar_select %p358_p1, %s1436_s20, %s360_s25  }
   0xd   : > { %p1568_p5 = por %p371_p2, %p370_p0  ;;  %p1572_p6 = por %p377_p4, %p376_p3 }
   0xe   : > { %1969 = sst [smem:[#allocation7_spill]] %s1566_s27  ;;  %p1275_p7 = scmp.ge.s32.totalorder %s1440_s21, 1 }
   0xf   : > { %s1971_s29 = scalar_select %p1572_p6, 1, 0 }
  0x10   : > { %p448_p8 = scmp.lt.s32.totalorder %s1440_s21, 3 }
  0x11   : > { %1972 = sst [smem:[#allocation8_spill]] %s1971_s29 }
  0x12   : > { %p449_p9 = pnand %p1275_p7, %p448_p8 }
  0x13   : > { %p499_p10 = scmp.lt.s32.totalorder (!%p449_p9), %s1551_s22, 1  ;;  %s1973_s0 = sld [smem:[#allocation9_spill]] (!%p449_p9) }
  0x14   : > { %452 = sbr.rel (%p449_p9) target bundleno = 2552 (0x9f8), region = 80  ;;  %s1974_s1 = sld [smem:[#allocation10_spill]] (!%p449_p9) }
  0x15   : > { %s1443_s24 = smov (!%p449_p9), 48   ;;  %s1444_s29 = smov (!%p449_p9), 64  }
  0x16   : > { %s1445_s26 = smov (!%p449_p9), 112   ;;  %s1446_s17 = smov (!%p449_p9), 96  }
  0x17   : > { %s1447_s23 = smov (!%p449_p9), 80   ;;  %s1449_s27 = smov (!%p449_p9), 16  }
  0x19   : > { %s1580_s30 = scalar_select %p499_p10, %s1551_s22, 1  ;;  %vm510_vm0 = vcmask 523264   ;;  %v1442_v2 = vmov 64.0   ;;  %v564_v14 = vld [vmem:[%s1949_s5 + $0x70] sm:$0xff]  ;;  %v565_v15 = vld [vmem:[%s1949_s5 + $0x78] sm:$0xff]  ;;  %v562_v16 = vld [vmem:[%s1949_s5 + $0x60] sm:$0xff] }
  0x1a   : > { %1354 = vrcp.f32 %v1442_v2  ;;  %577 = vmatpush.msra.mxu0 %v564_v14  ;;  %597 = vmatpush.msra.mxu1 %v565_v15  ;;  %v563_v17 = vld [vmem:[%s1949_s5 + $0x68] sm:$0xff]  ;;  %v560_v18 = vld [vmem:[%s1949_s5 + $0x50] sm:$0xff]  ;;  %v561_v19 = vld [vmem:[%s1949_s5 + $0x58] sm:$0xff]  ;;  %vm615_vm5 = vcmask 130048   ;;  %vm642_vm7 = vcmask 64512  }
  0x1b   : > { %s1960_s16 = sshll.u32 %s1580_s30, 3  ;;  %v558_v20 = vld [vmem:[%s1949_s5 + $0x40] sm:$0xff]  ;;  %v559_v21 = vld [vmem:[%s1949_s5 + $0x48] sm:$0xff]  ;;  %v556_v22 = vld [vmem:[%s1949_s5 + $0x30] sm:$0xff] }
  0x1c   : > { %s502_s25 = scalar_lea.vmem %s1973_s0, %s1960_s16  ;;  %578 = vmatpush.msra.mxu0 %v562_v16  ;;  %598 = vmatpush.msra.mxu1 %v563_v17  ;;  %v557_v23 = vld [vmem:[%s1949_s5 + $0x38] sm:$0xff]  ;;  %v554_v24 = vld [vmem:[%s1949_s5 + $0x20] sm:$0xff]  ;;  %v555_v25 = vld [vmem:[%s1949_s5 + $0x28] sm:$0xff] }
  0x1d   : > { %v507_v0 = vld [vmem:[%s502_s25] sm:$0xff]  ;;  %v552_v26 = vld [vmem:[%s1949_s5 + $0x10] sm:$0xff]  ;;  %v553_v27 = vld [vmem:[%s1949_s5 + $0x18] sm:$0xff]  ;;  %s1975_s25 = sshll.u32 %s1580_s30, 3  ;;  %s1448_s30 = smov 32  }
  0x1e   : > { %v511_v1 = vsel %vm510_vm0, %v507_v0, 0.0  ;;  %579 = vmatpush.msra.mxu0 %v560_v18  ;;  %599 = vmatpush.msra.mxu1 %v561_v19  ;;  %v550_v28 = vld [vmem:[%s1949_s5] sm:$0xff]  ;;  %v551_v29 = vld [vmem:[%s1949_s5 + $0x8] sm:$0xff]  ;;  %s506_s20 = scalar_lea.vmem %s1946_s2, %s1975_s25 }
  0x1f   : > { %512 = vadd.xlane.f32.xlu0 %v511_v1  ;;  %v1347_v39 = vld [vmem:[%s1947_s3] ss:$0 sm:$0xff] }
  0x20   : > { %v1355_v3 = vpop.eup %1354  ;;  %580 = vmatpush.msra.mxu0 %v558_v20  ;;  %600 = vmatpush.msra.mxu1 %v559_v21  ;;  %v1348_v42 = vld [vmem:[%s1948_s4] ss:$0 sm:$0xff] }
  0x21   : > { %v515_v4 = vmul.f32 64.0, %v1355_v3  ;;  %vm519_vm1 = vweird.f32 %v1355_v3  ;;  %v548_v44 = vld [vmem:[%s1974_s1] sm:$0xff] }
  0x22   : > { %581 = vmatpush.msra.mxu0 %v556_v22  ;;  %601 = vmatpush.msra.mxu1 %v557_v23  ;;  %v609_v52 = vld [vmem:[%s506_s20] sm:$0xff] }
  0x23   : > { %v516_v5 = vsub.f32 1.0, %v515_v4  ;;  %vm610_vm6 = vcmp.ge.f32.partialorder %v609_v52, 0.5 }
  0x24   : > { %582 = vmatpush.msra.mxu0 %v554_v24  ;;  %602 = vmatpush.msra.mxu1 %v555_v25 }
  0x25   : > { %v517_v6 = vmul.f32 %v1355_v3, %v516_v5 }
  0x26   : > { %583 = vmatpush.msra.mxu0 %v552_v26  ;;  %603 = vmatpush.msra.mxu1 %v553_v27 }
  0x27   : > { %v518_v7 = vadd.f32 %v1355_v3, %v517_v6 }
  0x28   : > { %584 = vmatpush.msra.mxu0 %v550_v28  ;;  %604 = vmatpush.msra.mxu1 %v551_v29 }
  0x29   : > { %v1589_v8 = vsel %vm519_vm1, %v1355_v3, %v518_v7 }
  0x92   : > { %v513_v9 = vpop.xlane.xlu0 %512 }
  0x93   : > { %v521_v10 = vmul.f32 %v1589_v8, %v513_v9 }
  0x95   : > { %v522_v11 = vsub.f32 %v507_v0, %v521_v10 }
  0x97   : > { %v523_v12 = vmul.f32 %v522_v11, %v522_v11 }
  0x99   : > { %v524_v13 = vsel %vm510_vm0, %v523_v12, 0.0 }
  0x9a   : > { %525 = vadd.xlane.f32.xlu0 %v524_v13 }
 0x10d   : > { %v526_v30 = vpop.xlane.xlu0 %525 }
 0x10e   : > { %v527_v31 = vmul.f32 %v526_v30, %v1589_v8 }
 0x110   : > { %v528_v32 = vadd.f32 1e-05, %v527_v31 }
 0x112   : > { %1356 = vrsqrt.f32 %v528_v32  ;;  %vm535_vm3 = vweird.f32 %v528_v32 }
 0x118   : > { %v1357_v33 = vpop.eup %1356 }
 0x119   : > { %v530_v34 = vmul.f32 %v1357_v33, %v528_v32  ;;  %vm536_vm2 = vweird.f32 %v1357_v33 }
 0x11a   : > { %vm537_vm4 = vmor %vm535_vm3, %vm536_vm2 }
 0x11b   : > { %v531_v35 = vmul.f32 %v1357_v33, %v530_v34 }
 0x11d   : > { %v532_v36 = vmul.f32 0.5, %v531_v35 }
 0x11f   : > { %v533_v37 = vsub.f32 1.5, %v532_v36 }
 0x121   : > { %v534_v38 = vmul.f32 %v1357_v33, %v533_v37 }
 0x123   : > { %v538_v40 = vsel %vm537_vm4, %v1357_v33, %v534_v38 }
 0x124   : > { %v539_v41 = vmul.f32 %v538_v40, %v522_v11 }
 0x126   : > { %v543_v43 = vmul.f32 %v1347_v39, %v539_v41 }
 0x128   : > { %v547_v45 = vadd.f32 %v1348_v42, %v543_v43 }
 0x12a   : > { %v1651_v46 = vadd.f32 %v548_v44, %v547_v45 }
 0x12c   : > { %1279 = vmatmul.msk.f32.vlgmr.msra.gmra.mxu0 %vm510_vm0, %v1651_v46  ;;  %1280 = vmatmul.msk.f32.vlgmr.msra.gmra.mxu1 %vm510_vm0, %v1651_v46 }
 0x1a9   : > { %v586_v47 = vpop.f32.mrf.mxu0  ;;  %v1657_v48 = vpop.f32.mrf.mxu1 }
 0x1aa   : > { %685 = vmatpush.msra.mxu3 %v1657_v48  ;;  %692 = vrot.lane.b32.xlu2 %v586_v47, %s1443_s24  ;;  %v611_v49 = vmul.f32 0.25, %v586_v47 }
 0x1ab   : > { %613 = vrot.lane.b32.xlu1 %v586_v47, %s1444_s29 }
 0x1ac   : > { %690 = vrot.lane.b32.xlu0 %v611_v49, %s1445_s26 }
 0x1b4   : > { %770 = vrot.lane.b32.xlu0 %v611_v49, %s1446_s17 }
 0x1bc   : > { %849 = vrot.lane.b32.xlu0 %v611_v49, %s1447_s23 }
 0x204   : > { %v693_v50 = vpop.permute.xlu2 %692 }
 0x205   : > { %1284 = vmatpush.xpose.msk.msrb.mxu3 %vm615_vm5, %v693_v50 }
 0x21d   : > { %v614_v51 = vpop.permute.xlu1 %613 }
 0x21e   : > { %1281 = vmatpush.xpose.msk.msra.mxu2 %vm615_vm5, %v614_v51  ;;  %v691_v61 = vpop.permute.xlu0 %690 }
 0x221   : > { %1282 = vmatmul.msk.f32.vlgmr.msra.gmra.mxu2 %vm615_vm5, %v611_v49 }
 0x226   : > { %v771_v2 = vpop.permute.xlu0 %770 }
 0x22e   : > { %v850_v14 = vpop.permute.xlu0 %849 }
 0x2a4   : > { %v638_v53 = vpop.f32.mrf.mxu2 }
 0x2a5   : > { %v641_v54 = vsel %vm610_vm6, -1e+18, %v638_v53 }
 0x2a6   : > { %v643_v55 = vsel %vm642_vm7, %v641_v54, -inf }
 0x2a7   : > { %644 = vmax.xlane.f32.xlu1 %v643_v55 }
 0x31a   : > { %v645_v56 = vpop.xlane.xlu1 %644 }
 0x31b   : > { %v646_v57 = vsub.f32 %v641_v54, %v645_v56 }
 0x31d   : > { %v647_v58 = vmul.f32 1.442695, %v646_v57 }
 0x31f   : > { %1358 = vpow2.f32 %v647_v58 }
 0x325   : > { %v1359_v59 = vpop.eup %1358 }
 0x326   : > { %v649_v60 = vsel %vm642_vm7, %v1359_v59, 0.0 }
 0x327   : > { %650 = vadd.xlane.f32.xlu2 %v649_v60 }
 0x33f   : > { %772 = vrot.lane.b32.xlu2 %v586_v47, %s1448_s30 }
 0x347   : > { %851 = vrot.lane.b32.xlu2 %v586_v47, %s1449_s27 }
 0x39a   : > { %v651_v62 = vpop.xlane.xlu2 %650 }
 0x39b   : > { %1360 = vrcp.f32 %v651_v62  ;;  %v663_v4 = vand.u32 2147483648, %v651_v62  ;;  %v661_v6 = vand.u32 2147483647, %v651_v62  ;;  %vm657_vm9 = vweird.f32 %v651_v62 }
 0x39d   : > { %v664_v9 = vor.u32 1.1754944e-38, %v663_v4  ;;  %vm662_vm11 = vcmp.eq.f32.partialorder %v661_v6, 8.507059e+37 }
 0x3a1   : > { %v1361_v63 = vpop.eup %1360 }
 0x3a2   : > { %v653_v0 = vmul.f32 %v1361_v63, %v651_v62  ;;  %v773_v1 = vpop.permute.xlu2 %772  ;;  %vm658_vm8 = vweird.f32 %v1361_v63 }
 0x3a3   : > { %vm659_vm10 = vmor %vm657_vm9, %vm658_vm8 }
 0x3a4   : > { %v654_v3 = vsub.f32 1.0, %v653_v0 }
 0x3a6   : > { %v655_v5 = vmul.f32 %v1361_v63, %v654_v3 }
 0x3a8   : > { %v656_v7 = vadd.f32 %v1361_v63, %v655_v5 }
 0x3aa   : > { %v852_v10 = vpop.permute.xlu2 %851  ;;  %v660_v11 = vsel %vm659_vm10, %v1361_v63, %v656_v7 }
 0x3ab   : > { %1290 = vmatpush.xpose.msk.msrb.mxu0 %vm615_vm5, %v852_v10  ;;  %v665_v12 = vsel %vm662_vm11, %v664_v9, %v660_v11  ;;  %vm943_vm11 = vcmask 392192  }
 0x3ac   : > { %v666_v13 = vmul.f32 %v1359_v59, %v665_v12 }
 0x3ae   : > { %1283 = vmatmul.msk.f32.vlgmr.msra.gmra.mxu3 %vm642_vm7, %v666_v13  ;;  %1291 = vmatmul.msk.f32.vlgmr.msrb.gmra.mxu0 %vm615_vm5, %v850_v14 }
 0x3af   : > { %1287 = vmatpush.xpose.msk.msra.mxu3 %vm615_vm5, %v773_v1 }
 0x3b6   : > { %1285 = vmatmul.msk.f32.vlgmr.msrb.gmra.mxu3 %vm615_vm5, %v691_v61 }
 0x3be   : > { %1288 = vmatmul.msk.f32.vlgmr.msra.gmra.mxu3 %vm615_vm5, %v771_v2 }
 0x42b   : > { %v874_v15 = vpop.f32.mrf.mxu0 }
 0x42c   : > { %v877_v16 = vsel %vm610_vm6, -1e+18, %v874_v15 }
 0x42d   : > { %v878_v17 = vsel %vm642_vm7, %v877_v16, -inf }
 0x42e   : > { %879 = vmax.xlane.f32.xlu0 %v878_v17 }
 0x431   : > { %v1685_v18 = vpop.f32.mrf.mxu3 }
 0x439   : > { %v715_v19 = vpop.f32.mrf.mxu3 }
 0x43a   : > { %v718_v20 = vsel %vm610_vm6, -1e+18, %v715_v19 }
 0x43b   : > { %v719_v21 = vsel %vm642_vm7, %v718_v20, -inf }
 0x43c   : > { %720 = vmax.xlane.f32.xlu2 %v719_v21  ;;  %v952_v21 = vld [vmem:[%s1950_s6 + $0x38] sm:$0xff] }
 0x441   : > { %v795_v22 = vpop.f32.mrf.mxu3 }
 0x442   : > { %v798_v23 = vsel %vm610_vm6, -1e+18, %v795_v22  ;;  %902 = vrot.lane.b32.xlu0 %v1657_v48, %s1447_s23  ;;  %v951_v22 = vld [vmem:[%s1950_s6 + $0x30] sm:$0xff] }
 0x443   : > { %v799_v24 = vsel %vm642_vm7, %v798_v23, -inf }
 0x444   : > { %800 = vmax.xlane.f32.xlu1 %v799_v24  ;;  %v949_v24 = vld [vmem:[%s1950_s6 + $0x20] sm:$0xff] }
 0x454   : > { %823 = vrot.lane.b32.xlu2 %v1657_v48, %s1446_s17 }
 0x4a1   : > { %v880_v25 = vpop.xlane.xlu0 %879 }
 0x4a2   : > { %v881_v26 = vsub.f32 %v877_v16, %v880_v25  ;;  %v948_v25 = vld [vmem:[%s1950_s6 + $0x18] sm:$0xff] }
 0x4a4   : > { %v882_v27 = vmul.f32 1.442695, %v881_v26  ;;  %v947_v26 = vld [vmem:[%s1950_s6 + $0x10] sm:$0xff] }
 0x4a6   : > { %1362 = vpow2.f32 %v882_v27  ;;  %v946_v27 = vld [vmem:[%s1950_s6 + $0x8] sm:$0xff] }
 0x4ac   : > { %v1363_v28 = vpop.eup %1362 }
 0x4ad   : > { %v884_v29 = vsel %vm642_vm7, %v1363_v28, 0.0 }
 0x4ae   : > { %885 = vadd.xlane.f32.xlu1 %v884_v29 }
 0x4af   : > { %v721_v30 = vpop.xlane.xlu2 %720 }
 0x4b0   : > { %v722_v31 = vsub.f32 %v718_v20, %v721_v30 }
 0x4b2   : > { %v723_v32 = vmul.f32 1.442695, %v722_v31 }
 0x4b4   : > { %1364 = vpow2.f32 %v723_v32  ;;  %v903_v33 = vpop.permute.xlu0 %902 }
 0x4b5   : > { %923 = vmatpush.msra.mxu0 %v903_v33 }
 0x4b7   : > { %v801_v34 = vpop.xlane.xlu1 %800  ;;  %v824_v12 = vpop.permute.xlu2 %823 }
 0x4b8   : > { %v802_v35 = vsub.f32 %v798_v23, %v801_v34  ;;  %v950_v23 = vld [vmem:[%s1950_s6 + $0x28] sm:$0xff] }
 0x4ba   : > { %v1365_v36 = vpop.eup %1364  ;;  %v803_v37 = vmul.f32 1.442695, %v802_v35 }
 0x4bb   : > { %v725_v38 = vsel %vm642_vm7, %v1365_v36, 0.0 }
 0x4bc   : > { %1366 = vpow2.f32 %v803_v37  ;;  %726 = vadd.xlane.f32.xlu1 %v725_v38 }
 0x4c2   : > { %v1367_v39 = vpop.eup %1366 }
 0x4c3   : > { %v805_v40 = vsel %vm642_vm7, %v1367_v39, 0.0 }
 0x4c4   : > { %806 = vadd.xlane.f32.xlu1 %v805_v40 }
 0x4dd   : > { %744 = vrot.lane.b32.xlu1 %v1657_v48, %s1445_s26  ;;  %s1297_s26 = sshll.u32 %s1551_s22, 3 }
 0x521   : > { %v886_v41 = vpop.xlane.xlu1 %885 }
 0x522   : > { %1368 = vrcp.f32 %v886_v41  ;;  %v898_v45 = vand.u32 2147483648, %v886_v41  ;;  %v896_v49 = vand.u32 2147483647, %v886_v41  ;;  %vm892_vm13 = vweird.f32 %v886_v41 }
 0x524   : > { %v899_v52 = vor.u32 1.1754944e-38, %v898_v45  ;;  %vm897_vm15 = vcmp.eq.f32.partialorder %v896_v49, 8.507059e+37  ;;  %v1018_v45 = vld [vmem:[%s1953_s9 + $0x50] sm:$0xff]  ;;  %v1016_v49 = vld [vmem:[%s1953_s9 + $0x40] sm:$0xff] }
 0x528   : > { %v1369_v42 = vpop.eup %1368 }
 0x529   : > { %v888_v43 = vmul.f32 %v1369_v42, %v886_v41  ;;  %vm893_vm12 = vweird.f32 %v1369_v42 }
 0x52a   : > { %vm894_vm14 = vmor %vm892_vm13, %vm893_vm12 }
 0x52b   : > { %v889_v44 = vsub.f32 1.0, %v888_v43  ;;  %v1020_v43 = vld [vmem:[%s1953_s9 + $0x60] sm:$0xff] }
 0x52d   : > { %v890_v47 = vmul.f32 %v1369_v42, %v889_v44  ;;  %v1021_v44 = vld [vmem:[%s1953_s9 + $0x68] sm:$0xff] }
 0x52f   : > { %v891_v50 = vadd.f32 %v1369_v42, %v890_v47  ;;  %v727_v51 = vpop.xlane.xlu1 %726  ;;  %v1019_v47 = vld [vmem:[%s1953_s9 + $0x58] sm:$0xff] }
 0x530   : > { %1370 = vrcp.f32 %v727_v51  ;;  %v739_v0 = vand.u32 2147483648, %v727_v51  ;;  %vm733_vm2 = vweird.f32 %v727_v51  ;;  %v737_v1 = vand.u32 2147483647, %v727_v51 }
 0x531   : > { %v895_v53 = vsel %vm894_vm14, %v1369_v42, %v891_v50  ;;  %v1022_v42 = vld [vmem:[%s1953_s9 + $0x70] sm:$0xff]  ;;  %v1017_v50 = vld [vmem:[%s1953_s9 + $0x48] sm:$0xff] }
 0x532   : > { %v900_v54 = vsel %vm897_vm15, %v899_v52, %v895_v53  ;;  %v740_v4 = vor.u32 1.1754944e-38, %v739_v0  ;;  %vm738_vm4 = vcmp.eq.f32.partialorder %v737_v1, 8.507059e+37  ;;  %v1015_v52 = vld [vmem:[%s1953_s9 + $0x38] sm:$0xff]  ;;  %v1012_v53 = vld [vmem:[%s1953_s9 + $0x20] sm:$0xff]  ;;  %v1088_v0 = vld [vmem:[%s1955_s11 + $0x68] sm:$0xff] }
 0x533   : > { %v901_v55 = vmul.f32 %v1363_v28, %v900_v54  ;;  %v945_v28 = vld [vmem:[%s1950_s6] sm:$0xff]  ;;  %v1013_v54 = vld [vmem:[%s1953_s9 + $0x28] sm:$0xff] }
 0x535   : > { %1292 = vmatmul.msk.f32.vlgmr.msra.gmra.mxu0 %vm642_vm7, %v901_v55  ;;  %v1010_v55 = vld [vmem:[%s1953_s9 + $0x10] sm:$0xff] }
 0x536   : > { %v1371_v48 = vpop.eup %1370 }
 0x537   : > { %v807_v56 = vpop.xlane.xlu1 %806  ;;  %v729_v57 = vmul.f32 %v1371_v48, %v727_v51  ;;  %vm734_vm1 = vweird.f32 %v1371_v48  ;;  %v1014_v51 = vld [vmem:[%s1953_s9 + $0x30] sm:$0xff] }
 0x538   : > { %1372 = vrcp.f32 %v807_v56  ;;  %vm735_vm3 = vmor %vm733_vm2, %vm734_vm1  ;;  %v819_v7 = vand.u32 2147483648, %v807_v56  ;;  %vm813_vm8 = vweird.f32 %v807_v56  ;;  %v817_v9 = vand.u32 2147483647, %v807_v56 }
 0x539   : > { %v730_v58 = vsub.f32 1.0, %v729_v57  ;;  %v1009_v57 = vld [vmem:[%s1953_s9 + $0x8] sm:$0xff] }
 0x53a   : > { %v820_v14 = vor.u32 1.1754944e-38, %v819_v7  ;;  %vm818_vm10 = vcmp.eq.f32.partialorder %v817_v9, 8.507059e+37  ;;  %v1101_v7 = vld [vmem:[%s1955_s11 + $0xd0] sm:$0xff] }
 0x53b   : > { %v731_v60 = vmul.f32 %v1371_v48, %v730_v58  ;;  %v1106_v58 = vld [vmem:[%s1955_s11 + $0xf8] sm:$0xff]  ;;  %v1085_v9 = vld [vmem:[%s1955_s11 + $0x50] sm:$0xff] }
 0x53c   : > { %1131 = vmatpush.msrb.mxu3 %v1106_v58 }
 0x53d   : > { %v732_v62 = vadd.f32 %v1371_v48, %v731_v60  ;;  %v1090_v60 = vld [vmem:[%s1955_s11 + $0x78] sm:$0xff] }
 0x53e   : > { %v1373_v59 = vpop.eup %1372  ;;  %1111 = vmatpush.msrb.mxu1 %v1090_v60 }
 0x53f   : > { %v809_v61 = vmul.f32 %v1373_v59, %v807_v56  ;;  %v736_v3 = vsel %vm735_vm3, %v1371_v48, %v732_v62  ;;  %vm814_vm6 = vweird.f32 %v1373_v59  ;;  %v1011_v48 = vld [vmem:[%s1953_s9 + $0x18] sm:$0xff]  ;;  %v1008_v56 = vld [vmem:[%s1953_s9] sm:$0xff]  ;;  %v1104_v62 = vld [vmem:[%s1955_s11 + $0xe8] sm:$0xff] }
 0x540   : > { %v741_v5 = vsel %vm738_vm4, %v740_v4, %v736_v3  ;;  %vm815_vm9 = vmor %vm813_vm8, %vm814_vm6  ;;  %v1087_v3 = vld [vmem:[%s1955_s11 + $0x60] sm:$0xff] }
 0x541   : > { %v810_v63 = vsub.f32 1.0, %v809_v61  ;;  %v742_v11 = vmul.f32 %v1365_v36, %v741_v5  ;;  %v1089_v61 = vld [vmem:[%s1955_s11 + $0x70] sm:$0xff]  ;;  %v1102_v5 = vld [vmem:[%s1955_s11 + $0xd8] sm:$0xff] }
 0x542   : > { %1112 = vmatpush.msrb.mxu1 %v1089_v61 }
 0x543   : > { %v811_v2 = vmul.f32 %v1373_v59, %v810_v63 }
 0x544   : > { %1113 = vmatpush.msrb.mxu1 %v1088_v0 }
 0x545   : > { %v812_v6 = vadd.f32 %v1373_v59, %v811_v2  ;;  %v1103_v2 = vld [vmem:[%s1955_s11 + $0xe0] sm:$0xff] }
 0x546   : > { %1114 = vmatpush.msrb.mxu1 %v1087_v3 }
 0x547   : > { %v816_v13 = vsel %vm815_vm9, %v1373_v59, %v812_v6  ;;  %v1105_v59 = vld [vmem:[%s1955_s11 + $0xf0] sm:$0xff]  ;;  %v1086_v6 = vld [vmem:[%s1955_s11 + $0x58] sm:$0xff] }
 0x548   : > { %v821_v15 = vsel %vm818_vm10, %v820_v14, %v816_v13  ;;  %1132 = vmatpush.msrb.mxu3 %v1105_v59  ;;  %1115 = vmatpush.msrb.mxu1 %v1086_v6  ;;  %v1083_v13 = vld [vmem:[%s1955_s11 + $0x40] sm:$0xff] }
 0x549   : > { %v822_v16 = vmul.f32 %v1367_v39, %v821_v15  ;;  %v1098_v15 = vld [vmem:[%s1955_s11 + $0xb8] sm:$0xff] }
 0x54a   : > { %1133 = vmatpush.msrb.mxu3 %v1104_v62  ;;  %1116 = vmatpush.msrb.mxu1 %v1085_v9  ;;  %v1352_v9 = vld [vmem:[%s1957_s13] ss:$0 sm:$0xff] }
 0x54c   : > { %1134 = vmatpush.msrb.mxu3 %v1103_v2 }
 0x54e   : > { %1135 = vmatpush.msrb.mxu3 %v1102_v5 }
 0x54f   : > { %v745_v10 = vpop.permute.xlu1 %744 }
 0x550   : > { %765 = vmatpush.msrb.mxu2 %v745_v10  ;;  %v1100_v10 = vld [vmem:[%s1955_s11 + $0xc8] sm:$0xff]  ;;  %1136 = vmatpush.msrb.mxu3 %v1101_v7 }
 0x551   : > { %1286 = vmatmul.msk.f32.vlgmr.msrb.gmra.mxu2 %vm642_vm7, %v742_v11  ;;  %v1084_v11 = vld [vmem:[%s1955_s11 + $0x48] sm:$0xff] }
 0x552   : > { %844 = vmatpush.msra.mxu2 %v824_v12  ;;  %v1099_v12 = vld [vmem:[%s1955_s11 + $0xc0] sm:$0xff]  ;;  %1137 = vmatpush.msrb.mxu3 %v1100_v10 }
 0x553   : > { %1117 = vmatpush.msrb.mxu1 %v1084_v11  ;;  %v1353_v11 = vld [vmem:[%s1958_s14] ss:$0 sm:$0xff] }
 0x554   : > { %964 = vmatpush.msrb.mxu2 %v952_v21  ;;  %1138 = vmatpush.msrb.mxu3 %v1099_v12  ;;  %v1081_v21 = vld [vmem:[%s1955_s11 + $0x30] sm:$0xff] }
 0x555   : > { %1118 = vmatpush.msrb.mxu1 %v1083_v13 }
 0x556   : > { %965 = vmatpush.msrb.mxu2 %v951_v22  ;;  %1139 = vmatpush.msrb.mxu3 %v1098_v15  ;;  %v1096_v22 = vld [vmem:[%s1955_s11 + $0xa8] sm:$0xff] }
 0x558   : > { %966 = vmatpush.msrb.mxu2 %v950_v23 }
 0x559   : > { %1289 = vmatmul.msk.f32.vlgmr.msra.gmra.mxu2 %vm642_vm7, %v822_v16  ;;  %vm941_vm7 = vcmask 261120  }
 0x55a   : > { %967 = vmatpush.msrb.mxu2 %v949_v24  ;;  %v1095_v24 = vld [vmem:[%s1955_s11 + $0xa0] sm:$0xff] }
 0x55c   : > { %968 = vmatpush.msrb.mxu2 %v948_v25 }
 0x55e   : > { %969 = vmatpush.msrb.mxu2 %v947_v26  ;;  %v1094_v26 = vld [vmem:[%s1955_s11 + $0x98] sm:$0xff] }
 0x560   : > { %970 = vmatpush.msrb.mxu2 %v946_v27 }
 0x562   : > { %971 = vmatpush.msrb.mxu2 %v945_v28  ;;  %v1349_v28 = vld [vmem:[%s1951_s7] ss:$0 sm:$0xff] }
 0x564   : > { %1041 = vmatpush.msra.mxu2 %v1022_v42  ;;  %v1024_v42 = vld [vmem:[%s1954_s10] sm:$0x3] }
 0x566   : > { %1042 = vmatpush.msra.mxu2 %v1020_v43 }
 0x568   : > { %1043 = vmatpush.msra.mxu2 %v1018_v45 }
 0x56a   : > { %1044 = vmatpush.msra.mxu2 %v1016_v49 }
 0x56c   : > { %1045 = vmatpush.msra.mxu2 %v1014_v51 }
 0x56e   : > { %1046 = vmatpush.msra.mxu2 %v1012_v53 }
 0x570   : > { %1047 = vmatpush.msra.mxu2 %v1010_v55 }
 0x572   : > { %1048 = vmatpush.msra.mxu2 %v1008_v56 }
 0x5b2   : > { %v925_v17 = vpop.f32.mrf.mxu0 }
 0x5b3   : > { %937 = vrot.lane.b32.xlu0 %v925_v17, %s1443_s24  ;;  %v1082_v17 = vld [vmem:[%s1955_s11 + $0x38] sm:$0xff]  ;;  %s1196_s24 = scalar_lea.hbm %s1959_s15, %s1297_s26 }
 0x5b4   : > { %1119 = vmatpush.msrb.mxu1 %v1082_v17  ;;  %s1200_s1 = sshll.u32 %s1196_s24, 4  ;;  %s1201_s1 = int_to_ptr.hbm [resolvable:$true] %s1200_s1 }
 0x5b5   : > { %s1392_s23 = sshra.s32 %s1201_s1, 4  ;;  %s1393_s23 = int_to_ptr.hbm [resolvable:$true] %s1392_s23 }
 0x5b6   : > { %1120 = vmatpush.msrb.mxu1 %v1081_v21  ;;  %s1394_s26 = scalar_lea.hbm %s1393_s23, 8  ;;  %p1399_p0 = scmp.lt.s32.totalorder %s1393_s23, %s1959_s15 }
 0x5b7   : > { %p1395_p11 = scmp.ne.s32.totalorder %s1393_s23, %s1394_s26 }
 0x5b9   : > { %p1396_p12 = pnand %p1395_p11, %p1568_p5 }
 0x5bb   : > { %p1397_p13 = pneg %p1396_p12 }
 0x5d4   : > { %v767_v19 = vpop.f32.mrf.mxu2 }
 0x5d5   : > { %929 = vrot.lane.b32.xlu1 %v767_v19, %s1449_s27  ;;  %v1097_v19 = vld [vmem:[%s1955_s11 + $0xb0] sm:$0xff]  ;;  %s496_s27 = sand.u32 1, %s1432_s19  }
 0x5d6   : > { %1140 = vmatpush.msrb.mxu3 %v1097_v19  ;;  %s1276_s29 = sshll.u32 %s496_s27, 3  ;;  %s1186_s17 = scalar_lea.sflag [#allocation3], %s496_s27 }
 0x5d8   : > { %1141 = vmatpush.msrb.mxu3 %v1096_v22 }
 0x5da   : > { %1142 = vmatpush.msrb.mxu3 %v1095_v24 }
 0x5dc   : > { %v846_v20 = vpop.f32.mrf.mxu2  ;;  %1143 = vmatpush.msrb.mxu3 %v1094_v26 }
 0x5dd   : > { %933 = vrot.lane.b32.xlu2 %v846_v20, %s1448_s30  ;;  %s498_s30 = scalar_lea.vmem [#allocation2], %s1276_s29  ;;  %s1398_s29 = scalar_lea.hbm %s1959_s15, 16 }
 0x5de   : > { %s1198_s22 = sshll.u32 %s498_s30, 4  ;;  %p1400_p1 = scmp.lt.s32.totalorder %s1398_s29, %s1394_s26  ;;  %s1199_s22 = int_to_ptr.vmem [resolvable:$true] %s1198_s22 }
 0x5e0   : > { %p1401_p2 = por %p1400_p1, %p1399_p0 }
 0x5e2   : > { %p1402_p3 = pnand %p1401_p2, %p1397_p13 }
 0x625   : > { %v938_v32 = vpop.permute.xlu0 %937 }
 0x637   : > { %v934_v30 = vpop.permute.xlu2 %933 }
 0x647   : > { %v930_v29 = vpop.permute.xlu1 %929 }
 0x648   : > { %v940_v31 = vsel %vm615_vm5, %v1685_v18, %v930_v29 }
 0x649   : > { %v942_v33 = vsel %vm941_vm7, %v940_v31, %v934_v30  ;;  %v1350_v31 = vld [vmem:[%s1952_s8] ss:$0 sm:$0xff] }
 0x64a   : > { %v944_v34 = vsel %vm943_vm11, %v942_v33, %v938_v32 }
 0x64b   : > { %1293 = vmatmul.msk.f32.vlgmr.msrb.gmra.mxu2 %vm510_vm0, %v944_v34  ;;  %v1080_v34 = vld [vmem:[%s1955_s11 + $0x28] sm:$0xff] }
 0x64c   : > { %1121 = vmatpush.msrb.mxu1 %v1080_v34 }
 0x6ce   : > { %v973_v35 = vpop.f32.mrf.mxu2 }
 0x6cf   : > { %v974_v36 = vadd.f32 %v973_v35, %v1651_v46  ;;  %v1023_v46 = vld [vmem:[%s1953_s9 + $0x78] sm:$0xff]  ;;  %v1093_v35 = vld [vmem:[%s1955_s11 + $0x90] sm:$0xff] }
 0x6d0   : > { %1061 = vmatpush.msrb.mxu0 %v1023_v46  ;;  %1144 = vmatpush.msrb.mxu3 %v1093_v35  ;;  %v1027_v46 = vperm.slane %v1024_v42, 1 }
 0x6d1   : > { %v978_v37 = vsel %vm510_vm0, %v974_v36, 0.0 }
 0x6d2   : > { %979 = vadd.xlane.f32.xlu1 %v978_v37  ;;  %1062 = vmatpush.msrb.mxu0 %v1021_v44  ;;  %v1092_v37 = vld [vmem:[%s1955_s11 + $0x88] sm:$0xff] }
 0x6d3   : > { %1145 = vmatpush.msrb.mxu3 %v1092_v37 }
 0x6d4   : > { %1063 = vmatpush.msrb.mxu0 %v1019_v47  ;;  %v1026_v47 = vperm.slane %v1024_v42, 0 }
 0x6d6   : > { %1064 = vmatpush.msrb.mxu0 %v1017_v50 }
 0x6d8   : > { %1065 = vmatpush.msrb.mxu0 %v1015_v52  ;;  %v1351_v52 = vld [vmem:[%s1956_s12] ss:$0 sm:$0xff] }
 0x6da   : > { %1066 = vmatpush.msrb.mxu0 %v1013_v54 }
 0x6dc   : > { %1067 = vmatpush.msrb.mxu0 %v1011_v48 }
 0x6de   : > { %1068 = vmatpush.msrb.mxu0 %v1009_v57 }
 0x745   : > { %v980_v38 = vpop.xlane.xlu1 %979 }
 0x746   : > { %v981_v39 = vmul.f32 %v980_v38, %v1589_v8  ;;  %v1078_v38 = vld [vmem:[%s1955_s11 + $0x18] sm:$0xff] }
 0x748   : > { %v1736_v40 = vsub.f32 %v974_v36, %v981_v39  ;;  %v1079_v36 = vld [vmem:[%s1955_s11 + $0x20] sm:$0xff] }
 0x749   : > { %1122 = vmatpush.msrb.mxu1 %v1079_v36  ;;  %v1091_v39 = vld [vmem:[%s1955_s11 + $0x80] sm:$0xff] }
 0x74a   : > { %v983_v41 = vmul.f32 %v1736_v40, %v1736_v40  ;;  %1146 = vmatpush.msrb.mxu3 %v1091_v39 }
 0x74b   : > { %1123 = vmatpush.msrb.mxu1 %v1078_v38 }
 0x74c   : > { %v984_v18 = vsel %vm510_vm0, %v983_v41, 0.0  ;;  %v1076_v41 = vld [vmem:[%s1955_s11 + $0x8] sm:$0xff] }
 0x74d   : > { %985 = vadd.xlane.f32.xlu2 %v984_v18  ;;  %v1075_v18 = vld [vmem:[%s1955_s11] sm:$0xff] }
 0x7c0   : > { %v986_v63 = vpop.xlane.xlu2 %985 }
 0x7c1   : > { %v987_v1 = vmul.f32 %v986_v63, %v1589_v8 }
 0x7c3   : > { %v988_v4 = vadd.f32 1e-05, %v987_v1 }
 0x7c5   : > { %1374 = vrsqrt.f32 %v988_v4  ;;  %vm995_vm12 = vweird.f32 %v988_v4 }
 0x7cb   : > { %v1375_v14 = vpop.eup %1374 }
 0x7cc   : > { %v990_v16 = vmul.f32 %v1375_v14, %v988_v4  ;;  %vm996_vm5 = vweird.f32 %v1375_v14 }
 0x7cd   : > { %vm997_vm13 = vmor %vm995_vm12, %vm996_vm5 }
 0x7ce   : > { %v991_v20 = vmul.f32 %v1375_v14, %v990_v16 }
 0x7d0   : > { %v992_v23 = vmul.f32 0.5, %v991_v20 }
 0x7d2   : > { %v993_v25 = vsub.f32 1.5, %v992_v23 }
 0x7d4   : > { %v994_v27 = vmul.f32 %v1375_v14, %v993_v25 }
 0x7d6   : > { %v998_v29 = vsel %vm997_vm13, %v1375_v14, %v994_v27 }
 0x7d7   : > { %v999_v30 = vmul.f32 %v998_v29, %v1736_v40  ;;  %v1077_v40 = vld [vmem:[%s1955_s11 + $0x10] sm:$0xff] }
 0x7d8   : > { %1124 = vmatpush.msrb.mxu1 %v1077_v40 }
 0x7d9   : > { %v1003_v32 = vmul.f32 %v1349_v28, %v999_v30 }
 0x7da   : > { %1125 = vmatpush.msrb.mxu1 %v1076_v41 }
 0x7db   : > { %v1007_v33 = vadd.f32 %v1350_v31, %v1003_v32 }
 0x7dc   : > { %1126 = vmatpush.msrb.mxu1 %v1075_v18 }
 0x7dd   : > { %1294 = vmatmul.msk.f32.vlgmr.msra.gmra.mxu2 %vm510_vm0, %v1007_v33  ;;  %1295 = vmatmul.msk.f32.vlgmr.msrb.gmra.mxu0 %vm510_vm0, %v1007_v33 }
 0x85a   : > { %v1070_v43 = vpop.f32.mrf.mxu0 }
 0x85b   : > { %v1071_v44 = vadd.f32 %v1070_v43, %v1027_v46 }
 0x85d   : > { %v1074_v45 = vmax.f32 %v1071_v44, 0.0 }
 0x85f   : > { %1147 = vmatmul.f32.vlgmr.msrb.gmra.mxu3 %v1074_v45 }
 0x860   : > { %v1050_v49 = vpop.f32.mrf.mxu2 }
 0x861   : > { %v1051_v50 = vadd.f32 %v1050_v49, %v1026_v47 }
 0x863   : > { %v1073_v51 = vmax.f32 %v1051_v50, 0.0 }
 0x865   : > { %1127 = vmatmul.f32.vlgmr.msrb.gmra.mxu1 %v1073_v51 }
 0x8e2   : > { %v1128_v53 = vpop.f32.mrf.mxu1  ;;  %v1148_v55 = vpop.f32.mrf.mxu3 }
 0x8e3   : > { %v1129_v54 = vadd.f32 %v1351_v52, %v1128_v53 }
 0x8e5   : > { %v1149_v48 = vadd.f32 %v1148_v55, %v1129_v54 }
 0x8e7   : > { %v1151_v56 = vadd.f32 %v1149_v48, %v1007_v33 }
 0x8e9   : > { %v1154_v57 = vsel %vm510_vm0, %v1151_v56, 0.0 }
 0x8ea   : > { %1155 = vadd.xlane.f32.xlu0 %v1154_v57 }
 0x95d   : > { %v1156_v58 = vpop.xlane.xlu0 %1155 }
 0x95e   : > { %v1157_v59 = vmul.f32 %v1156_v58, %v1589_v8 }
 0x960   : > { %v1158_v60 = vsub.f32 %v1151_v56, %v1157_v59 }
 0x962   : > { %v1159_v61 = vmul.f32 %v1158_v60, %v1158_v60 }
 0x964   : > { %v1160_v62 = vsel %vm510_vm0, %v1159_v61, 0.0 }
 0x965   : > { %1161 = vadd.xlane.f32.xlu1 %v1160_v62 }
 0x9d8   : > { %v1162_v63 = vpop.xlane.xlu1 %1161 }
 0x9d9   : > { %v1163_v0 = vmul.f32 %v1162_v63, %v1589_v8 }
 0x9db   : > { %v1164_v1 = vadd.f32 1e-05, %v1163_v0 }
 0x9dd   : > { %1376 = vrsqrt.f32 %v1164_v1  ;;  %vm1171_vm15 = vweird.f32 %v1164_v1 }
 0x9e3   : > { %v1377_v2 = vpop.eup %1376 }
 0x9e4   : > { %v1166_v3 = vmul.f32 %v1377_v2, %v1164_v1  ;;  %vm1172_vm14 = vweird.f32 %v1377_v2 }
 0x9e5   : > { %vm1173_vm1 = vmor %vm1171_vm15, %vm1172_vm14 }
 0x9e6   : > { %v1167_v4 = vmul.f32 %v1377_v2, %v1166_v3 }
 0x9e8   : > { %v1168_v5 = vmul.f32 0.5, %v1167_v4 }
 0x9ea   : > { %v1169_v6 = vsub.f32 1.5, %v1168_v5 }
 0x9ec   : > { %v1170_v7 = vmul.f32 %v1377_v2, %v1169_v6 }
 0x9ee   : > { %v1174_v8 = vsel %vm1173_vm1, %v1377_v2, %v1170_v7 }
 0x9ef   : > { %v1175_v10 = vmul.f32 %v1174_v8, %v1158_v60 }
 0x9f1   : > { %v1179_v12 = vmul.f32 %v1352_v9, %v1175_v10 }
 0x9f3   : > { %v1183_v13 = vadd.f32 %v1353_v11, %v1179_v12 }
 0x9f5   : > { %1184 = vst.msk [vmem:[%s498_s30] sm:$0xff] %vm510_vm0, %v1183_v13 }
 0x9f6   : > { %1405 = shalt.err (!%p1402_p3)
}
 0x9f7   : > { %1300 = dma.vmem_to_hbm [thread:$0]  (%p1568_p5), %s1199_s22, 128, %s1201_s1, %s1186_s17  }
 0x9f8 PF: > { %p1306_p4 = scmp.ge.s32.totalorder %s1440_s21, 2  ;;  %s1212_s20 = sand.u32 1, %s1428_s18  }
 0x9f9   : > { %s1213_s30 = scalar_lea.sflag [#allocation3], %s1212_s20 }
 0x9fa   : > { %p1303_p7 = pnand %p1306_p4, %p1572_p6 }
 0x9fc   : > { %p1304_p8 = pneg %p1303_p7 }
 0x9fe   : > { %1423 = dma.done.wait (%p1304_p8), %s1213_s30, 128  }
 0x9ff   : > { %1425 = vsyncadd (%p1304_p8), %s1213_s30, 4294967168  ;;  %s1977_s21 = sld [smem:[#allocation6_spill]]  ;;  %s1980_s18 = smov %s1432_s19 }
 0xa00   : > { %s1978_s23 = sld [smem:[#allocation5_spill]] }
 0xa01   : > { %s1979_s20 = sld [smem:[#allocation7_spill]] }
 0xa05   : > { %p25_p9 = scmp.ge.s32.totalorder %s1977_s21, 4  }
 0xa06   : > { %s1981_s19 = smov %s1978_s23 }
 0xa07   :  { %27 = sbr.rel (!%p25_p9) target bundleno = 6 (0x6), region = 118 }
 0xa0c   :  { %1219 = vsyncpa [#allocation3], 1 }
 0xa0d   :  { %1221 = vsyncpa [#allocation3 + $0x1], 1 }

</bundles_post_ra>
